<compile_context>
chip_gen: v6e
topology: v6e:2x2x1
jax: 0.10.0
libtpu: 0.0.40
codegen_flags: <defaults>
</compile_context>

<pallas_src>
import jax
import jax.numpy as jnp
from jax.experimental import pallas as pl
from jax.experimental.pallas import tpu as pltpu


def _autoencoder_kernel(x_ref, we_ref, be_ref, wd_ref, bd_ref, o_ref):
    # Encoder: (tm, D) @ (D, L) -> (tm, L); f32 accumulation on the MXU.
    z = jnp.dot(x_ref[...], we_ref[...], preferred_element_type=jnp.float32)
    z = z + be_ref[...]                                  # bias add in f32 (VPU)

    # Decoder: (tm, L) @ (L, D) -> (tm, D); cast z to the weight dtype so the
    # MXU runs at native (bf16) rate, accumulate in f32.
    x_hat = jnp.dot(z.astype(wd_ref.dtype), wd_ref[...],
                    preferred_element_type=jnp.float32)
    x_hat = x_hat + bd_ref[...]                          # bias add in f32
    o_ref[...] = x_hat.astype(o_ref.dtype)               # cast only at the store


def _round_up(v, m):
    return -(-v // m) * m


def autoencoder_forward(x, w_enc, b_enc, w_dec, b_dec, *,
                        tile_m=512, use_bf16=True):
    """x: (B, D); w_enc: (L, D); b_enc: (L,); w_dec: (D, L); b_dec: (D,).

    Weight layout follows PyTorch nn.Linear (out_features, in_features).
    """
    B, D = x.shape
    L = w_enc.shape[0]
    out_dtype = x.dtype
    mm_dtype = jnp.bfloat16 if use_bf16 else x.dtype

    # One-time wrapper-side transposes + casts (amortized over the whole batch):
    we_t = w_enc.T.astype(mm_dtype)          # (D, L) — encoder RHS, NN form
    wd_t = w_dec.T.astype(mm_dtype)          # (L, D) — decoder RHS, NN form
    x_mm = x.astype(mm_dtype)                # halve x HBM read bytes
    b_enc2 = b_enc.reshape(1, L).astype(jnp.float32)
    b_dec2 = b_dec.reshape(1, D).astype(jnp.float32)

    # Batch tile: multiple of 8 sublanes, at most `tile_m`, never larger than
    # the (rounded-up) batch, and capped at ceil(B/2) so the grid keeps >=2
    # steps whenever B > 8 (so v7x's two TensorCores both get work).
    half = _round_up(max(pl.cdiv(B, 2), 1), 8)
    tm = max(8, min(tile_m, half, _round_up(B, 8)))
    grid = (pl.cdiv(B, tm),)

    # VMEM budget derived from actual block sizes (double-buffered x/out tiles,
    # pinned weights, biases, plus slack for z / x_hat intermediates).
    isz_mm = jnp.dtype(mm_dtype).itemsize
    isz_out = jnp.dtype(out_dtype).itemsize
    working_set = (
        2 * tm * D * isz_mm                 # x tile, double-buffered
        + 2 * tm * D * isz_out              # out tile, double-buffered
        + 2 * (D * L + L * D) * isz_mm      # pinned weights (buffer slots)
        + 2 * (L + D) * 4                   # biases
        + 2 * tm * (L + D) * 4              # z / x_hat f32 intermediates
    )
    vmem_limit = min(max(int(working_set * 1.5) + (1 << 20), 4 << 20), 64 << 20)

    cost = pl.CostEstimate(
        flops=4 * B * D * L,                 # two matmuls, 2*B*D*L FLOPs each
        transcendentals=0,
        bytes_accessed=(x_mm.size * isz_mm + we_t.size * isz_mm
                        + wd_t.size * isz_mm + (L + D) * 4
                        + B * D * isz_out),
    )

    return pl.pallas_call(
        _autoencoder_kernel,
        out_shape=jax.ShapeDtypeStruct((B, D), out_dtype),
        grid=grid,
        in_specs=[
            # x tile marches over the batch axis (ragged last tile handled by
            # Pallas' masked block handling; rows are independent).
            pl.BlockSpec((tm, D), lambda i: (i, 0)),
            # Weights / biases pinned: constant index map -> DMA'd once,
            # VMEM-resident across all grid steps.
            pl.BlockSpec((D, L), lambda i: (0, 0)),
            pl.BlockSpec((1, L), lambda i: (0, 0)),
            pl.BlockSpec((L, D), lambda i: (0, 0)),
            pl.BlockSpec((1, D), lambda i: (0, 0)),
        ],
        out_specs=pl.BlockSpec((tm, D), lambda i: (i, 0)),
        compiler_params=pltpu.CompilerParams(
            dimension_semantics=("parallel",),
            vmem_limit_bytes=vmem_limit,
        ),
        cost_estimate=cost,
    )(x_mm, we_t, b_enc2, wd_t, b_dec2)


def reference_forward(x, w_enc, b_enc, w_dec, b_dec):
    z = x @ w_enc.T + b_enc
    return z @ w_dec.T + b_dec


if __name__ == "__main__":
    # Shapes consistent with the module: input_size=256, latent_size=128.
    # batch=256 exercises the batch grid (two 128-row tiles, tm capped at B/2).
    batch, input_size, latent_size = 256, 256, 128

    key = jax.random.PRNGKey(0)
    kx, kwe, kbe, kwd, kbd = jax.random.split(key, 5)

    x = jax.random.normal(kx, (batch, input_size), dtype=jnp.float32)
    # PyTorch Linear convention: weight is (out_features, in_features).
    w_enc = jax.random.normal(kwe, (latent_size, input_size), jnp.float32) * 0.05
    b_enc = jax.random.normal(kbe, (latent_size,), jnp.float32) * 0.05
    w_dec = jax.random.normal(kwd, (input_size, latent_size), jnp.float32) * 0.05
    b_dec = jax.random.normal(kbd, (input_size,), jnp.float32) * 0.05

    out = jax.block_until_ready(
        autoencoder_forward(x, w_enc, b_enc, w_dec, b_dec)
    )

    ref = reference_forward(x, w_enc, b_enc, w_dec, b_dec)
    assert out.shape == (batch, input_size)
    # bf16 matmul operands -> relaxed tolerance vs. the f32 reference.
    assert jnp.allclose(out, ref, atol=5e-2, rtol=5e-2), "mismatch vs reference"

    print("KERNEL_OK")
</pallas_src>

<mosaic_0001>
module attributes {stable_mosaic.version = 11 : i64} {
  func.func @_autoencoder_kernel(%arg0: i32, %arg1: memref<128x256xbf16, #tpu.memory_space<vmem>>, %arg2: memref<256x128xbf16, #tpu.memory_space<vmem>>, %arg3: memref<1x128xf32, #tpu.memory_space<vmem>>, %arg4: memref<128x256xbf16, #tpu.memory_space<vmem>>, %arg5: memref<1x256xf32, #tpu.memory_space<vmem>>, %arg6: memref<128x256xf32, #tpu.memory_space<vmem>>) attributes {dimension_semantics = [#tpu.dimension_semantics<parallel>], iteration_bounds = array<i64: 2>, scalar_prefetch = 0 : i64, scratch_operands = 0 : i64, tpu.core_type = #tpu.core_type<tc>, window_params = [{transform_indices = @transform_0, window_bounds = array<i64: 128, 256>}, {pipeline_mode = #tpu.pipeline_mode<synchronous>, transform_indices = @transform_1, window_bounds = array<i64: 256, 128>}, {pipeline_mode = #tpu.pipeline_mode<synchronous>, transform_indices = @transform_2, window_bounds = array<i64: 1, 128>}, {pipeline_mode = #tpu.pipeline_mode<synchronous>, transform_indices = @transform_3, window_bounds = array<i64: 128, 256>}, {pipeline_mode = #tpu.pipeline_mode<synchronous>, transform_indices = @transform_4, window_bounds = array<i64: 1, 256>}, {transform_indices = @transform_5, window_bounds = array<i64: 128, 256>}]} {
    %c0 = arith.constant 0 : index
    %c0_0 = arith.constant 0 : index
    %0 = vector.load %arg1[%c0, %c0_0] : memref<128x256xbf16, #tpu.memory_space<vmem>>, vector<128x256xbf16>
    %c0_1 = arith.constant 0 : index
    %c0_2 = arith.constant 0 : index
    %1 = vector.load %arg2[%c0_1, %c0_2] : memref<256x128xbf16, #tpu.memory_space<vmem>>, vector<256x128xbf16>
    %cst = arith.constant dense<0.000000e+00> : vector<128x128xf32>
    %2 = tpu.matmul %0, %1, %cst {dimension_numbers = #tpu.dot_dimension_numbers<[1], [0], [0], [1], [0, 0, 1, 1], [], []>} : vector<128x256xbf16>, vector<256x128xbf16>, vector<128x128xf32> -> vector<128x128xf32>
    %c0_3 = arith.constant 0 : index
    %c0_4 = arith.constant 0 : index
    %3 = vector.load %arg3[%c0_3, %c0_4] : memref<1x128xf32, #tpu.memory_space<vmem>>, vector<1x128xf32>
    %4 = vector.broadcast %3 : vector<1x128xf32> to vector<128x128xf32>
    %5 = arith.addf %2, %4 : vector<128x128xf32>
    %6 = arith.truncf %5 : vector<128x128xf32> to vector<128x128xbf16>
    %c0_5 = arith.constant 0 : index
    %c0_6 = arith.constant 0 : index
    %7 = vector.load %arg4[%c0_5, %c0_6] : memref<128x256xbf16, #tpu.memory_space<vmem>>, vector<128x256xbf16>
    %cst_7 = arith.constant dense<0.000000e+00> : vector<128x256xf32>
    %8 = tpu.matmul %6, %7, %cst_7 {dimension_numbers = #tpu.dot_dimension_numbers<[1], [0], [0], [1], [0, 0, 1, 1], [], []>} : vector<128x128xbf16>, vector<128x256xbf16>, vector<128x256xf32> -> vector<128x256xf32>
    %c0_8 = arith.constant 0 : index
    %c0_9 = arith.constant 0 : index
    %9 = vector.load %arg5[%c0_8, %c0_9] : memref<1x256xf32, #tpu.memory_space<vmem>>, vector<1x256xf32>
    %10 = vector.broadcast %9 : vector<1x256xf32> to vector<128x256xf32>
    %11 = arith.addf %8, %10 : vector<128x256xf32>
    %c0_10 = arith.constant 0 : index
    %c0_11 = arith.constant 0 : index
    %12 = vector.load %arg6[%c0_10, %c0_11] : memref<128x256xf32, #tpu.memory_space<vmem>>, vector<128x256xf32>
    tpu.vector_store %arg6[%c0_10, %c0_11], %11 {strides = array<i32>} : memref<128x256xf32, #tpu.memory_space<vmem>>, vector<128x256xf32>,
    return
  }
  func.func @transform_0(%arg0: i32) -> (i32, i32) {
    %c0_i32 = arith.constant 0 : i32
    %c0_i32_0 = arith.constant 0 : i32
    return %arg0, %c0_i32 : i32, i32
  }
  func.func @transform_1(%arg0: i32) -> (i32, i32) {
    %c0_i32 = arith.constant 0 : i32
    %c0_i32_0 = arith.constant 0 : i32
    %c0_i32_1 = arith.constant 0 : i32
    return %c0_i32, %c0_i32_0 : i32, i32
  }
  func.func @transform_2(%arg0: i32) -> (i32, i32) {
    %c0_i32 = arith.constant 0 : i32
    %c0_i32_0 = arith.constant 0 : i32
    %c0_i32_1 = arith.constant 0 : i32
    return %c0_i32, %c0_i32_0 : i32, i32
  }
  func.func @transform_3(%arg0: i32) -> (i32, i32) {
    %c0_i32 = arith.constant 0 : i32
    %c0_i32_0 = arith.constant 0 : i32
    %c0_i32_1 = arith.constant 0 : i32
    return %c0_i32, %c0_i32_0 : i32, i32
  }
  func.func @transform_4(%arg0: i32) -> (i32, i32) {
    %c0_i32 = arith.constant 0 : i32
    %c0_i32_0 = arith.constant 0 : i32
    %c0_i32_1 = arith.constant 0 : i32
    return %c0_i32, %c0_i32_0 : i32, i32
  }
  func.func @transform_5(%arg0: i32) -> (i32, i32) {
    %c0_i32 = arith.constant 0 : i32
    %c0_i32_0 = arith.constant 0 : i32
    return %arg0, %c0_i32 : i32, i32
  }
}

</mosaic_0001>

<bundles_post_ra>
// kernel: tpu_custom_call.1
= control target key start
LH: loop header
LB: loop body
LE: loop exit
PB: predicated region body
PF: predicated region fallthrough
CT: control target
= control target key end

     0   :  { %10 = vsyncpa [#allocation3], 0  ;;  %s1754_s0 = inlined_call_operand.hbm [shape: bf16[256,256], index: 0, kind: input, shape index: {}]   ;;  %s1755_s1 = inlined_call_operand.hbm [shape: bf16[256,128], index: 1, kind: input, shape index: {}]   ;;  %s1756_s2 = inlined_call_operand.vmem [shape: f32[1,128], index: 2, kind: input, shape index: {}]   ;;  %s1757_s3 = inlined_call_operand.hbm [shape: bf16[128,256], index: 3, kind: input, shape index: {}]   ;;  %s1758_s4 = inlined_call_operand.vmem [shape: f32[1,256], index: 4, kind: input, shape index: {}]   ;;  %s1759_s5 = inlined_call_operand.hbm [shape: f32[256,256], index: 5, kind: output, shape index: {}]  }
   0x1   :  { %12 = vsyncpa [#allocation3 + $0x1], 0 }
   0x2   :  { %13 = vsyncpa [#allocation6], 0 }
   0x3   :  { %14 = vsyncpa [#allocation4], 0 }
   0x4   :  { %16 = vsyncpa [#allocation4 + $0x1], 0  ;;  %s1438_s18 = smov 0   ;;  %s1440_s19 = smov 0  }
   0x5   :  { %s1442_s20 = smov 0   ;;  %s1444_s21 = smov 0  }
   0x6 LB: > { %s1459_s22 = sadd.s32 4294967295, %s1395_s21   ;;  %s972_s23 = sadd.s32 4294967294, %s1395_s21   ;;  %s1395_s21 = sphi %s1444_s21, %s1783_s21   ;;  %s1391_s20 = sphi %s1442_s20, %s1782_s20   ;;  %s1387_s19 = sphi %s1440_s19, %s1781_s19   ;;  %s1383_s18 = sphi %s1438_s18, %s1780_s18  }
   0x7   : > { %p42_p0 = scmp.ne.s32.totalorder %s1387_s19, %s1383_s18  ;;  %p1760_p1 = scmp.eq.s32.totalorder %s1459_s22, 0 }
   0x8   : > { %p156_p3 = scmp.eq.s32.totalorder %s972_s23, 1  ;;  %p973_p5 = scmp.ge.s32.totalorder %s1395_s21, 1 }
   0x9   : > { %p1468_p4 = por %p1760_p1, %p42_p0  ;;  %p163_p7 = scmp.lt.s32.totalorder %s1395_s21, 3 }
   0xa   : > { %p1473_p6 = por %p156_p3, %p42_p0  ;;  %s1397_s27 = smov [#allocation5]  }
   0xb   : > { %s1765_s24 = scalar_select %p1468_p4, 1, 0 }
   0xc   : > { %s1766_s25 = scalar_select %p1473_p6, 1, 0 }
   0xd   : > { %p1478_p8 = pnand %p973_p5, %p163_p7  ;;  %s175_s28 = sshll.u32 %s1397_s27, 4  ;;  %s176_s28 = int_to_ptr.vmem [resolvable:$true] %s175_s28 }
   0xe   : > { %s1398_s30 = smov [#allocation7]   ;;  %s1258_s7 = scalar_lea.vmem %s176_s28, 2048 }
   0xf   : > { %s1767_s26 = scalar_select %p1478_p8, 1, 0 }
  0x10   : > { %p1121_p9 = pneg %p1478_p8  ;;  %s191_s6 = sshll.u32 %s1398_s30, 4  ;;  %s192_s6 = int_to_ptr.vmem [resolvable:$true] %s191_s6 }
  0x11   : > { %p1259_p13 = scmp.ne.s32.totalorder %s176_s28, %s1258_s7  ;;  %p1266_p5 = scmp.lt.s32.totalorder %s176_s28, %s176_s28 }
  0x12   : > { %p1487_p11 = pnand %p1121_p9, %p1760_p1  ;;  %p1267_p7 = scmp.lt.s32.totalorder %s1258_s7, %s1258_s7 }
  0x14   : > { %p1249_p12 = pneg %p1487_p11  ;;  %p1268_p10 = por %p1267_p7, %p1266_p5 }
  0x16   : > { %p1261_p0 = pnand %p1259_p13, %p1249_p12 }
  0x18   : > { %p1262_p3 = pneg %p1261_p0 }
  0x1a   : > { %p1269_p9 = pnand %p1268_p10, %p1262_p3 }
  0x1c   : > { %1272 = shalt.err (!%p1269_p9)
}
  0x1d   : > { %s1399_s8 = smov 64   ;;  %s1400_s9 = smov 4  }
  0x1e   : > { %1124 = dma.hbm_to_vmem [thread:$0]  (!%p1487_p11), %s1755_s1, 2048, %s176_s28, [#allocation6], %s1399_s8, %s1399_s8, %s1400_s9  }
  0x1f   : > { %s1284_s12 = scalar_lea.vmem %s192_s6, 2048  ;;  %p1292_p2 = scmp.lt.s32.totalorder %s192_s6, %s192_s6 }
  0x20   : > { %p1285_p1 = scmp.ne.s32.totalorder %s192_s6, %s1284_s12  ;;  %p1293_p6 = scmp.lt.s32.totalorder %s1284_s12, %s1284_s12 }
  0x22   : > { %p1287_p13 = pnand %p1285_p1, %p1249_p12  ;;  %p1294_p5 = por %p1293_p6, %p1292_p2 }
  0x24   : > { %p1288_p0 = pneg %p1287_p13 }
  0x26   : > { %p1295_p10 = pnand %p1294_p5, %p1288_p0 }
  0x28   : > { %1298 = shalt.err (!%p1295_p10)
}
  0x29   : > { %s1761_s13 = smov 128   ;;  %s1402_s14 = smov 8  }
  0x2a   : > { %1127 = dma.hbm_to_vmem [thread:$0]  (!%p1487_p11), %s1757_s3, 2048, %s192_s6, [#allocation6], %s1761_s13, %s1761_s13, %s1402_s14  }
  0x2b   : > { %s1513_s17 = sadd.s32 1, %s1395_s21   ;;  %s29_s27 = sadd.s32 1, %s1391_s20 }
  0x2c   : > { %s26_s23 = ssub.s32 %s1395_s21, %s1513_s17  ;;  %p36_p2 = scmp.ne.s32.totalorder %s1391_s20, %s1387_s19 }
  0x2d   : > { %p27_p1 = scmp.eq.s32.totalorder %s26_s23, 0  ;;  %p37_p6 = scmp.eq.s32.totalorder %s1395_s21, 0 }
  0x2e   : > { %p1769_p3 = scmp.eq.s32.totalorder %s1459_s22, 1  ;;  %p1138_p9 = scmp.lt.s32.totalorder %s1395_s21, 2 }
  0x2f   : > { %s1522_s28 = scalar_select %p27_p1, %s1391_s20, %s29_s27  }
  0x30   : > { %p38_p12 = por %p37_p6, %p36_p2  ;;  %p1526_p7 = por %p1769_p3, %p36_p2 }
  0x31   : > { %s208_s30 = sand.u32 1, %s1391_s20   ;;  %s1042_s6 = sshll.u32 %s1395_s21, 11 }
  0x32   : > { %s1770_s29 = scalar_select %p1526_p7, 1, 0 }
  0x33   : > { %s977_s7 = sshll.u32 %s208_s30, 7  ;;  %s1536_s10 = scalar_lea.hbm %s1754_s0, %s1042_s6 }
  0x34   : > { %s212_s11 = scalar_lea.vmem [#allocation2], %s977_s7  ;;  %p1540_p11 = pnand %p1138_p9, %p38_p12 }
  0x35   : > { %s220_s12 = sshll.u32 %s212_s11, 4  ;;  %s1544_s16 = scalar_lea.sflag [#allocation3], %s208_s30  ;;  %s1538_s12 = int_to_ptr.vmem [resolvable:$true] %s220_s12 }
  0x36   : > { %s1299_s23 = scalar_lea.hbm %s1536_s10, 2048  ;;  %p1301_p0 = pneg %p1540_p11 }
  0x37   : > { %p1300_p13 = scmp.ne.s32.totalorder %s1536_s10, %s1299_s23  ;;  %s1304_s7 = scalar_lea.hbm %s1754_s0, 4096 }
  0x38   : > { %p1305_p1 = scmp.lt.s32.totalorder %s1536_s10, %s1754_s0  ;;  %p1306_p2 = scmp.lt.s32.totalorder %s1304_s7, %s1299_s23 }
  0x39   : > { %p1302_p5 = pnand %p1301_p0, %p1300_p13 }
  0x3a   : > { %p1307_p6 = por %p1306_p2, %p1305_p1 }
  0x3b   : > { %p1303_p10 = pneg %p1302_p5 }
  0x3d   : > { %p1308_p12 = pnand %p1307_p6, %p1303_p10 }
  0x3f   : > { %1311 = shalt.err (!%p1308_p12)
}
  0x40   : > { %s1312_s30 = scalar_lea.vmem %s1538_s12, 2048  ;;  %s1403_s11 = smov [#allocation2]  }
  0x41   : > { %p1313_p3 = scmp.ne.s32.totalorder %s1538_s12, %s1312_s30  ;;  %s1317_s13 = sshll.u32 %s1403_s11, 4  ;;  %s1318_s13 = int_to_ptr.vmem [resolvable:$false] %s1317_s13 }
  0x42   : > { %s1319_s27 = scalar_lea.vmem %s1318_s13, 4096  ;;  %p1320_p5 = scmp.lt.s32.totalorder %s1538_s12, %s1318_s13 }
  0x43   : > { %p1315_p9 = pnand %p1313_p3, %p1301_p0  ;;  %p1321_p7 = scmp.lt.s32.totalorder %s1319_s27, %s1312_s30 }
  0x45   : > { %p1316_p13 = pneg %p1315_p9  ;;  %p1322_p4 = por %p1321_p7, %p1320_p5 }
  0x47   : > { %p1323_p8 = pnand %p1322_p4, %p1316_p13 }
  0x49   : > { %1326 = shalt.err (!%p1323_p8)
}
  0x4a   : > { %s1772_s23 = smov 128   ;;  %p1773_p0 = scmp.ne.s32.totalorder %s1767_s26, 0 }
  0x4b   : > { %1131 = dma.hbm_to_vmem [thread:$0]  (!%p1540_p11), %s1536_s10, 2048, %s1538_s12, %s1544_s16, %s1772_s23, %s1772_s23, %s1402_s14  }
  0x4c   : > { %232 = sbr.rel (%p1773_p0) target bundleno = 594 (0x252), region = 40  ;;  %s1571_s6 = sand.u32 (!%p1773_p0), 1, %s1387_s19  }
  0x4d   : > { %s982_s13 = sshll.u32 (!%p1773_p0), %s1571_s6, 7  ;;  %s235_s7 = scalar_lea.sflag (!%p1773_p0), [#allocation3], %s1571_s6 }
  0x4e   : > { %s1575_s8 = scalar_lea.vmem (!%p1773_p0), [#allocation2], %s982_s13  ;;  %p1774_p4 = scmp.ne.s32.totalorder (!%p1773_p0), %s1765_s24, 0 }
  0x51   : > { %1370 = dma.done.wait (%p1774_p4), %s235_s7, 2048  }
  0x52   : > { %1372 = vsyncadd (%p1774_p4), %s235_s7, 4294965248  ;;  %p1775_p8 = scmp.eq.s32.totalorder %s1459_s22, 0 }
  0x54   : > { %1374 = dma.done.wait (%p1775_p8), [#allocation6], 4096   ;;  %p1776_p7 = pmov %p1775_p8 }
  0x55   : > { %v1183_v0 = vld [vmem:[#allocation5 + $0x78] sm:$0xff]   ;;  %v1185_v2 = vld [vmem:[#allocation5 + $0x70] sm:$0xff]   ;;  %v1187_v4 = vld [vmem:[#allocation5 + $0x68] sm:$0xff]   ;;  %v1404_v48 = vmov 0   ;;  %s985_s12 = sshll.u32 %s1571_s6, 8  ;;  %s1044_s16 = sshll.u32 %s1459_s22, 12 }
  0x56   : > { %1376 = vsyncadd (%p1776_p7), [#allocation6], 4294963200  ;;  %v1184_v1 = vld [vmem:[#allocation5 + $0x38] sm:$0xff]   ;;  %1045 = vmatprep.subr.bf16.mxu0 %v1183_v0  ;;  %v1186_v3 = vld [vmem:[#allocation5 + $0x30] sm:$0xff]   ;;  %752 = vmatprep.mubr.bf16.mxu1 %v1404_v48  ;;  %s1639_s15 = scalar_lea.vmem [#allocation8], %s985_s12  ;;  %s1706_s27 = scalar_lea.hbm %s1759_s5, %s1044_s16 }
  0x57   : > { %1046 = vmatpush3.bf16.msra.mxu0 %v1184_v1  ;;  %v1188_v5 = vld [vmem:[#allocation5 + $0x28] sm:$0xff]   ;;  %v1189_v6 = vld [vmem:[#allocation5 + $0x60] sm:$0xff]   ;;  %v1191_v8 = vld [vmem:[#allocation5 + $0x58] sm:$0xff]   ;;  %s880_s9 = sshll.u32 %s1639_s15, 4  ;;  %s866_s22 = scalar_lea.sflag [#allocation4], %s1571_s6  ;;  %s1708_s9 = int_to_ptr.vmem [resolvable:$true] %s880_s9 }
  0x58   : > { %1047 = vmatprep.subr.bf16.mxu0 %v1185_v2  ;;  %v1190_v7 = vld [vmem:[#allocation5 + $0x20] sm:$0xff]   ;;  %v1192_v9 = vld [vmem:[#allocation5 + $0x18] sm:$0xff]   ;;  %v1193_v10 = vld [vmem:[#allocation5 + $0x50] sm:$0xff]   ;;  %s1327_s23 = scalar_lea.vmem %s1708_s9, 4096  ;;  %p1777_p10 = scmp.ne.s32.totalorder %s1770_s29, 0 }
  0x59   : > { %v1201_v11 = vld [vmem:[%s1575_s8 + $0x4] ss:$8 sps:$4 sm:$0xff]   ;;  %v1194_v12 = vld [vmem:[#allocation5 + $0x10] sm:$0xff]   ;;  %v1199_v20 = vld [vmem:[%s1575_s8] ss:$8 sps:$4 sm:$0xff]   ;;  %p1328_p11 = scmp.ne.s32.totalorder %s1708_s9, %s1327_s23  ;;  %s1405_s13 = smov [#allocation8]  }
  0x5a   : > { %539 = vmatprep.mubr.bf16.mxu0 %v1201_v11  ;;  %v1195_v13 = vld [vmem:[#allocation5 + $0x48] sm:$0xff]   ;;  %v1197_v15 = vld [vmem:[#allocation5 + $0x40] sm:$0xff]   ;;  %v1223_v17 = vld [vmem:[#allocation7 + $0x74] ss:$8 sps:$4 sm:$0xff]   ;;  %s1331_s7 = sshll.u32 %s1405_s13, 4  ;;  %s1332_s7 = int_to_ptr.vmem [resolvable:$false] %s1331_s7 }
  0x5b   : > { %1048 = vmatpush3.bf16.msra.mxu0 %v1186_v3  ;;  %v1196_v14 = vld [vmem:[#allocation5 + $0x8] sm:$0xff]   ;;  %v1198_v16 = vld [vmem:[#allocation5] sm:$0xff]   ;;  %v1225_v18 = vld [vmem:[#allocation7 + $0x70] ss:$8 sps:$4 sm:$0xff]   ;;  %720 = vmatprep.subr.bf16.mxu1 %v1223_v17  ;;  %p1329_p1 = pnand %p1328_p11, %p1777_p10  ;;  %p1334_p6 = scmp.lt.s32.totalorder %s1708_s9, %s1332_s7 }
  0x5c   : > { %1049 = vmatprep.subr.bf16.mxu0 %v1187_v4  ;;  %v1226_v19 = vld [vmem:[#allocation7 + $0x64] ss:$8 sps:$4 sm:$0xff]   ;;  %721 = vmatpush1.bf16.msra.mxu1 %v1225_v18  ;;  %v1228_v21 = vld [vmem:[#allocation7 + $0x60] ss:$8 sps:$4 sm:$0xff]   ;;  %v1202_v22 = vld [vmem:[%s1575_s8 + $0x14] ss:$8 sps:$4 sm:$0xff]  }
  0x5d   : > { %722 = vmatprep.subr.bf16.mxu1 %v1226_v19  ;;  %v1229_v23 = vld [vmem:[#allocation7 + $0x54] ss:$8 sps:$4 sm:$0xff]   ;;  %v1231_v24 = vld [vmem:[#allocation7 + $0x50] ss:$8 sps:$4 sm:$0xff]   ;;  %v1232_v25 = vld [vmem:[#allocation7 + $0x44] ss:$8 sps:$4 sm:$0xff]   ;;  %p1330_p2 = pneg %p1329_p1 }
  0x5e   : > { %v1204_v26 = vld [vmem:[%s1575_s8 + $0x10] ss:$8 sps:$4 sm:$0xff]   ;;  %v1234_v27 = vld [vmem:[#allocation7 + $0x40] ss:$8 sps:$4 sm:$0xff]   ;;  %v1205_v28 = vld [vmem:[%s1575_s8 + $0x24] ss:$8 sps:$4 sm:$0xff]  }
  0x5f   : > { %1050 = vmatpush3.bf16.msra.mxu0 %v1188_v5  ;;  %v1235_v29 = vld [vmem:[#allocation7 + $0x34] ss:$8 sps:$4 sm:$0xff]   ;;  %v1237_v30 = vld [vmem:[#allocation7 + $0x30] ss:$8 sps:$4 sm:$0xff]   ;;  %v1207_v31 = vld [vmem:[%s1575_s8 + $0x20] ss:$8 sps:$4 sm:$0xff]  }
  0x60   : > { %1051 = vmatprep.subr.bf16.mxu0 %v1189_v6  ;;  %723 = vmatpush1.bf16.msra.mxu1 %v1228_v21  ;;  %v1208_v32 = vld [vmem:[%s1575_s8 + $0x34] ss:$8 sps:$4 sm:$0xff]   ;;  %v1210_v33 = vld [vmem:[%s1575_s8 + $0x30] ss:$8 sps:$4 sm:$0xff]   ;;  %v1211_v34 = vld [vmem:[%s1575_s8 + $0x44] ss:$8 sps:$4 sm:$0xff]  }
  0x61   : > { %724 = vmatprep.subr.bf16.mxu1 %v1229_v23  ;;  %v1213_v35 = vld [vmem:[%s1575_s8 + $0x40] ss:$8 sps:$4 sm:$0xff]   ;;  %v1214_v36 = vld [vmem:[%s1575_s8 + $0x54] ss:$8 sps:$4 sm:$0xff]   ;;  %v1216_v37 = vld [vmem:[%s1575_s8 + $0x50] ss:$8 sps:$4 sm:$0xff]  }
  0x62   : > { %v1217_v38 = vld [vmem:[%s1575_s8 + $0x64] ss:$8 sps:$4 sm:$0xff]   ;;  %v1219_v39 = vld [vmem:[%s1575_s8 + $0x60] ss:$8 sps:$4 sm:$0xff]   ;;  %v1220_v40 = vld [vmem:[%s1575_s8 + $0x74] ss:$8 sps:$4 sm:$0xff]  }
  0x63   : > { %1052 = vmatpush3.bf16.msra.mxu0 %v1190_v7  ;;  %v1222_v41 = vld [vmem:[%s1575_s8 + $0x70] ss:$8 sps:$4 sm:$0xff]   ;;  %v1238_v42 = vld [vmem:[#allocation7 + $0x24] ss:$8 sps:$4 sm:$0xff]   ;;  %v1240_v43 = vld [vmem:[#allocation7 + $0x20] ss:$8 sps:$4 sm:$0xff]  }
  0x64   : > { %1053 = vmatprep.subr.bf16.mxu0 %v1191_v8  ;;  %725 = vmatpush1.bf16.msra.mxu1 %v1231_v24  ;;  %v1241_v44 = vld [vmem:[#allocation7 + $0x14] ss:$8 sps:$4 sm:$0xff]   ;;  %v1243_v45 = vld [vmem:[#allocation7 + $0x10] ss:$8 sps:$4 sm:$0xff]   ;;  %v1244_v46 = vld [vmem:[#allocation7 + $0x4] ss:$8 sps:$4 sm:$0xff]  }
  0x65   : > { %726 = vmatprep.subr.bf16.mxu1 %v1232_v25  ;;  %v1246_v47 = vld [vmem:[#allocation7] ss:$8 sps:$4 sm:$0xff]   ;;  %s1333_s8 = scalar_lea.vmem %s1332_s7, 8192 }
  0x66   : > { %v1605_v53 = vld [vmem:[%s1756_s2] ss:$0 sm:$0xff]  ;;  %p1335_p12 = scmp.lt.s32.totalorder %s1333_s8, %s1327_s23 }
  0x67   : > { %1054 = vmatpush3.bf16.msra.mxu0 %v1192_v9 }
  0x68   : > { %1055 = vmatprep.subr.bf16.mxu0 %v1193_v10  ;;  %727 = vmatpush1.bf16.msra.mxu1 %v1234_v27  ;;  %p1336_p3 = por %p1335_p12, %p1334_p6 }
  0x69   : > { %728 = vmatprep.subr.bf16.mxu1 %v1235_v29 }
  0x6a   : > { %p1337_p9 = pnand %p1336_p3, %p1330_p2 }
  0x6b   : > { %1056 = vmatpush3.bf16.msra.mxu0 %v1194_v12 }
  0x6c   : > { %1057 = vmatprep.subr.bf16.mxu0 %v1195_v13  ;;  %729 = vmatpush1.bf16.msra.mxu1 %v1237_v30 }
  0x6d   : > { %730 = vmatprep.subr.bf16.mxu1 %v1238_v42 }
  0x6f   : > { %1058 = vmatpush3.bf16.msra.mxu0 %v1196_v14 }
  0x70   : > { %1059 = vmatprep.subr.bf16.mxu0 %v1197_v15  ;;  %731 = vmatpush1.bf16.msra.mxu1 %v1240_v43 }
  0x71   : > { %732 = vmatprep.subr.bf16.mxu1 %v1241_v44 }
  0x73   : > { %1060 = vmatpush3.bf16.msra.mxu0 %v1198_v16 }
  0x74   : > { %733 = vmatpush1.bf16.msra.mxu1 %v1243_v45 }
  0x75   : > { %734 = vmatprep.subr.bf16.mxu1 %v1244_v46 }
  0x76   : > { %540 = vmatmul.mubr.bf16.vlgmr.msra.gmra.mxu0 %v1199_v20 }
  0x77   : > { %547 = vmatprep.mubr.bf16.mxu0 %v1202_v22 }
  0x78   : > { %735 = vmatpush1.bf16.msra.mxu1 %v1246_v47 }
  0x7e   : > { %548 = vmatmul.mubr.bf16.gmra.mxu0 %v1204_v26 }
  0x7f   : > { %555 = vmatprep.mubr.bf16.mxu0 %v1205_v28 }
  0x86   : > { %556 = vmatmul.mubr.bf16.gmra.mxu0 %v1207_v31 }
  0x87   : > { %563 = vmatprep.mubr.bf16.mxu0 %v1208_v32 }
  0x8e   : > { %564 = vmatmul.mubr.bf16.gmra.mxu0 %v1210_v33 }
  0x8f   : > { %571 = vmatprep.mubr.bf16.mxu0 %v1211_v34 }
  0x96   : > { %572 = vmatmul.mubr.bf16.gmra.mxu0 %v1213_v35 }
  0x97   : > { %579 = vmatprep.mubr.bf16.mxu0 %v1214_v36 }
  0x9e   : > { %580 = vmatmul.mubr.bf16.gmra.mxu0 %v1216_v37 }
  0x9f   : > { %587 = vmatprep.mubr.bf16.mxu0 %v1217_v38 }
  0xa6   : > { %588 = vmatmul.mubr.bf16.gmra.mxu0 %v1219_v39 }
  0xa7   : > { %595 = vmatprep.mubr.bf16.mxu0 %v1220_v40 }
  0xae   : > { %596 = vmatmul.mubr.bf16.gmra.mxu0 %v1222_v41 }
 0x136   : > { %v1061_v49 = vpop.f32.mrf.mxu0 }
 0x138   : > { %v1062_v50 = vpop.f32.mrf.mxu0 }
 0x139   : > { %v1063_v52 = vadd.f32 %v1062_v50, %v1061_v49 }
 0x13a   : > { %v1064_v51 = vpop.f32.mrf.mxu0 }
 0x13b   : > { %v542_v57 = vadd.f32 %v1063_v52, %v1605_v53 }
 0x13c   : > { %v1065_v54 = vpop.f32.mrf.mxu0 }
 0x13d   : > { %v1066_v55 = vadd.f32 %v1065_v54, %v1064_v51 }
 0x13e   : > { %v1067_v56 = vpop.f32.mrf.mxu0 }
 0x13f   : > { %v545_v58 = vadd.f32 %v1066_v55, %v1605_v53 }
 0x140   : > { %v1068_v59 = vpop.f32.mrf.mxu0 }
 0x141   : > { %v604_v60 = vpack.c.bf16 %v545_v58, %v542_v57  ;;  %v1069_v62 = vadd.f32 %v1068_v59, %v1067_v56 }
 0x142   : > { %v1070_v61 = vpop.f32.mrf.mxu0 }
 0x143   : > { %753 = vmatmul.mubr.bf16.vlgmr.msra.gmra.mxu1 %v604_v60  ;;  %v550_v2 = vadd.f32 %v1069_v62, %v1605_v53  ;;  %v630_v60 = vlaneseq }
 0x144   : > { %v1071_v63 = vpop.f32.mrf.mxu0  ;;  %762 = vmatprep.mubr.bf16.mxu1 %v1404_v48 }
 0x145   : > { %v1072_v0 = vadd.f32 %v1071_v63, %v1070_v61  ;;  %v631_v61 = vshrl.u32 %v630_v60, 7  ;;  %v628_v63 = vld [vmem:[%s1758_s4] sm:$0x3] }
 0x146   : > { %v1073_v1 = vpop.f32.mrf.mxu0 }
 0x147   : > { %v553_v3 = vadd.f32 %v1072_v0, %v1605_v53  ;;  %v632_v62 = vsub.s32 0, %v631_v61  ;;  %v636_v0 = vsub.s32 1, %v631_v61 }
 0x148   : > { %v1074_v4 = vpop.f32.mrf.mxu0 }
 0x149   : > { %v605_v5 = vpack.c.bf16 %v553_v3, %v550_v2  ;;  %v1075_v7 = vadd.f32 %v1074_v4, %v1073_v1  ;;  %v1634_v1 = vrot.slane %v628_v63, %v632_v62  ;;  %v1636_v2 = vrot.slane %v628_v63, %v636_v0 }
 0x14a   : > { %v1076_v6 = vpop.f32.mrf.mxu0 }
 0x14b   : > { %763 = vmatmul.mubr.bf16.gmra.mxu1 %v605_v5  ;;  %v558_v11 = vadd.f32 %v1075_v7, %v1605_v53 }
 0x14c   : > { %v1077_v8 = vpop.f32.mrf.mxu0  ;;  %772 = vmatprep.mubr.bf16.mxu1 %v1404_v48 }
 0x14d   : > { %v1078_v9 = vadd.f32 %v1077_v8, %v1076_v6 }
 0x14e   : > { %v1079_v10 = vpop.f32.mrf.mxu0 }
 0x14f   : > { %v561_v12 = vadd.f32 %v1078_v9, %v1605_v53 }
 0x150   : > { %v1080_v13 = vpop.f32.mrf.mxu0 }
 0x151   : > { %v606_v14 = vpack.c.bf16 %v561_v12, %v558_v11  ;;  %v1081_v16 = vadd.f32 %v1080_v13, %v1079_v10 }
 0x152   : > { %v1082_v15 = vpop.f32.mrf.mxu0 }
 0x153   : > { %773 = vmatmul.mubr.bf16.gmra.mxu1 %v606_v14  ;;  %v566_v20 = vadd.f32 %v1081_v16, %v1605_v53 }
 0x154   : > { %v1083_v17 = vpop.f32.mrf.mxu0  ;;  %782 = vmatprep.mubr.bf16.mxu1 %v1404_v48 }
 0x155   : > { %v1084_v18 = vadd.f32 %v1083_v17, %v1082_v15 }
 0x156   : > { %v1085_v19 = vpop.f32.mrf.mxu0 }
 0x157   : > { %v569_v21 = vadd.f32 %v1084_v18, %v1605_v53 }
 0x158   : > { %v1086_v22 = vpop.f32.mrf.mxu0 }
 0x159   : > { %v607_v23 = vpack.c.bf16 %v569_v21, %v566_v20  ;;  %v1087_v25 = vadd.f32 %v1086_v22, %v1085_v19 }
 0x15a   : > { %v1088_v24 = vpop.f32.mrf.mxu0 }
 0x15b   : > { %783 = vmatmul.mubr.bf16.gmra.mxu1 %v607_v23  ;;  %v574_v29 = vadd.f32 %v1087_v25, %v1605_v53 }
 0x15c   : > { %v1089_v26 = vpop.f32.mrf.mxu0  ;;  %792 = vmatprep.mubr.bf16.mxu1 %v1404_v48 }
 0x15d   : > { %v1090_v27 = vadd.f32 %v1089_v26, %v1088_v24 }
 0x15e   : > { %v1091_v28 = vpop.f32.mrf.mxu0 }
 0x15f   : > { %v577_v30 = vadd.f32 %v1090_v27, %v1605_v53 }
 0x160   : > { %v1092_v31 = vpop.f32.mrf.mxu0 }
 0x161   : > { %v608_v32 = vpack.c.bf16 %v577_v30, %v574_v29  ;;  %v1093_v34 = vadd.f32 %v1092_v31, %v1091_v28 }
 0x162   : > { %v1094_v33 = vpop.f32.mrf.mxu0 }
 0x163   : > { %793 = vmatmul.mubr.bf16.gmra.mxu1 %v608_v32  ;;  %v582_v38 = vadd.f32 %v1093_v34, %v1605_v53 }
 0x164   : > { %v1095_v35 = vpop.f32.mrf.mxu0  ;;  %802 = vmatprep.mubr.bf16.mxu1 %v1404_v48 }
 0x165   : > { %v1096_v36 = vadd.f32 %v1095_v35, %v1094_v33 }
 0x166   : > { %v1097_v37 = vpop.f32.mrf.mxu0 }
 0x167   : > { %v585_v39 = vadd.f32 %v1096_v36, %v1605_v53 }
 0x168   : > { %v1098_v40 = vpop.f32.mrf.mxu0 }
 0x169   : > { %v609_v41 = vpack.c.bf16 %v585_v39, %v582_v38  ;;  %v1099_v43 = vadd.f32 %v1098_v40, %v1097_v37 }
 0x16a   : > { %v1100_v42 = vpop.f32.mrf.mxu0 }
 0x16b   : > { %803 = vmatmul.mubr.bf16.gmra.mxu1 %v609_v41  ;;  %v590_v47 = vadd.f32 %v1099_v43, %v1605_v53 }
 0x16c   : > { %v1101_v44 = vpop.f32.mrf.mxu0  ;;  %812 = vmatprep.mubr.bf16.mxu1 %v1404_v48 }
 0x16d   : > { %v1102_v45 = vadd.f32 %v1101_v44, %v1100_v42 }
 0x16e   : > { %v1103_v46 = vpop.f32.mrf.mxu0 }
 0x16f   : > { %v593_v49 = vadd.f32 %v1102_v45, %v1605_v53 }
 0x170   : > { %v1104_v50 = vpop.f32.mrf.mxu0 }
 0x171   : > { %v610_v51 = vpack.c.bf16 %v593_v49, %v590_v47  ;;  %v1105_v54 = vadd.f32 %v1104_v50, %v1103_v46 }
 0x172   : > { %v1106_v52 = vpop.f32.mrf.mxu0 }
 0x173   : > { %813 = vmatmul.mubr.bf16.gmra.mxu1 %v610_v51  ;;  %v598_v57 = vadd.f32 %v1105_v54, %v1605_v53 }
 0x174   : > { %v1107_v55 = vpop.f32.mrf.mxu0  ;;  %822 = vmatprep.mubr.bf16.mxu1 %v1404_v48 }
 0x175   : > { %v1108_v56 = vadd.f32 %v1107_v55, %v1106_v52 }
 0x177   : > { %v601_v58 = vadd.f32 %v1108_v56, %v1605_v53 }
 0x179   : > { %v611_v59 = vpack.c.bf16 %v601_v58, %v598_v57 }
 0x17b   : > { %823 = vmatmul.mubr.bf16.gmra.mxu1 %v611_v59 }
 0x203   : > { %v754_v48 = vpop.f32.mrf.mxu1 }
 0x204   : > { %v755_v3 = vadd.f32 %v754_v48, %v1634_v1 }
 0x205   : > { %v756_v4 = vpop.f32.mrf.mxu1 }
 0x206   : > { %833 = vst [vmem:[%s1639_s15] sm:$0xff] %v755_v3  ;;  %v757_v53 = vadd.f32 %v756_v4, %v1636_v2 }
 0x207   : > { %v758_v5 = vpop.f32.mrf.mxu1 }
 0x208   : > { %834 = vst [vmem:[%s1639_s15 + $0x8] sm:$0xff] %v757_v53  ;;  %v759_v6 = vadd.f32 %v758_v5, %v1634_v1 }
 0x209   : > { %v760_v7 = vpop.f32.mrf.mxu1 }
 0x20a   : > { %835 = vst [vmem:[%s1639_s15 + $0x10] sm:$0xff] %v759_v6  ;;  %v761_v8 = vadd.f32 %v760_v7, %v1636_v2 }
 0x20b   : > { %v764_v9 = vpop.f32.mrf.mxu1 }
 0x20c   : > { %836 = vst [vmem:[%s1639_s15 + $0x18] sm:$0xff] %v761_v8  ;;  %v765_v10 = vadd.f32 %v764_v9, %v1634_v1 }
 0x20d   : > { %v766_v11 = vpop.f32.mrf.mxu1 }
 0x20e   : > { %837 = vst [vmem:[%s1639_s15 + $0x20] sm:$0xff] %v765_v10  ;;  %v767_v12 = vadd.f32 %v766_v11, %v1636_v2 }
 0x20f   : > { %v768_v13 = vpop.f32.mrf.mxu1 }
 0x210   : > { %838 = vst [vmem:[%s1639_s15 + $0x28] sm:$0xff] %v767_v12  ;;  %v769_v14 = vadd.f32 %v768_v13, %v1634_v1 }
 0x211   : > { %v770_v15 = vpop.f32.mrf.mxu1 }
 0x212   : > { %839 = vst [vmem:[%s1639_s15 + $0x30] sm:$0xff] %v769_v14  ;;  %v771_v16 = vadd.f32 %v770_v15, %v1636_v2 }
 0x213   : > { %v774_v17 = vpop.f32.mrf.mxu1 }
 0x214   : > { %840 = vst [vmem:[%s1639_s15 + $0x38] sm:$0xff] %v771_v16  ;;  %v775_v18 = vadd.f32 %v774_v17, %v1634_v1 }
 0x215   : > { %v776_v19 = vpop.f32.mrf.mxu1 }
 0x216   : > { %841 = vst [vmem:[%s1639_s15 + $0x40] sm:$0xff] %v775_v18  ;;  %v777_v20 = vadd.f32 %v776_v19, %v1636_v2 }
 0x217   : > { %v778_v21 = vpop.f32.mrf.mxu1 }
 0x218   : > { %842 = vst [vmem:[%s1639_s15 + $0x48] sm:$0xff] %v777_v20  ;;  %v779_v22 = vadd.f32 %v778_v21, %v1634_v1 }
 0x219   : > { %v780_v23 = vpop.f32.mrf.mxu1 }
 0x21a   : > { %843 = vst [vmem:[%s1639_s15 + $0x50] sm:$0xff] %v779_v22  ;;  %v781_v24 = vadd.f32 %v780_v23, %v1636_v2 }
 0x21b   : > { %v784_v25 = vpop.f32.mrf.mxu1 }
 0x21c   : > { %844 = vst [vmem:[%s1639_s15 + $0x58] sm:$0xff] %v781_v24  ;;  %v785_v26 = vadd.f32 %v784_v25, %v1634_v1 }
 0x21d   : > { %v786_v27 = vpop.f32.mrf.mxu1 }
 0x21e   : > { %845 = vst [vmem:[%s1639_s15 + $0x60] sm:$0xff] %v785_v26  ;;  %v787_v28 = vadd.f32 %v786_v27, %v1636_v2 }
 0x21f   : > { %v788_v29 = vpop.f32.mrf.mxu1 }
 0x220   : > { %846 = vst [vmem:[%s1639_s15 + $0x68] sm:$0xff] %v787_v28  ;;  %v789_v30 = vadd.f32 %v788_v29, %v1634_v1 }
 0x221   : > { %v790_v31 = vpop.f32.mrf.mxu1 }
 0x222   : > { %847 = vst [vmem:[%s1639_s15 + $0x70] sm:$0xff] %v789_v30  ;;  %v791_v32 = vadd.f32 %v790_v31, %v1636_v2 }
 0x223   : > { %v794_v33 = vpop.f32.mrf.mxu1 }
 0x224   : > { %848 = vst [vmem:[%s1639_s15 + $0x78] sm:$0xff] %v791_v32  ;;  %v795_v34 = vadd.f32 %v794_v33, %v1634_v1 }
 0x225   : > { %v796_v35 = vpop.f32.mrf.mxu1 }
 0x226   : > { %849 = vst [vmem:[%s1639_s15 + $0x80] sm:$0xff] %v795_v34  ;;  %v797_v36 = vadd.f32 %v796_v35, %v1636_v2 }
 0x227   : > { %v798_v37 = vpop.f32.mrf.mxu1 }
 0x228   : > { %850 = vst [vmem:[%s1639_s15 + $0x88] sm:$0xff] %v797_v36  ;;  %v799_v38 = vadd.f32 %v798_v37, %v1634_v1 }
 0x229   : > { %v800_v39 = vpop.f32.mrf.mxu1 }
 0x22a   : > { %851 = vst [vmem:[%s1639_s15 + $0x90] sm:$0xff] %v799_v38  ;;  %v801_v40 = vadd.f32 %v800_v39, %v1636_v2 }
 0x22b   : > { %v804_v41 = vpop.f32.mrf.mxu1 }
 0x22c   : > { %852 = vst [vmem:[%s1639_s15 + $0x98] sm:$0xff] %v801_v40  ;;  %v805_v42 = vadd.f32 %v804_v41, %v1634_v1 }
 0x22d   : > { %v806_v43 = vpop.f32.mrf.mxu1 }
 0x22e   : > { %853 = vst [vmem:[%s1639_s15 + $0xa0] sm:$0xff] %v805_v42  ;;  %v807_v44 = vadd.f32 %v806_v43, %v1636_v2 }
 0x22f   : > { %v808_v45 = vpop.f32.mrf.mxu1 }
 0x230   : > { %854 = vst [vmem:[%s1639_s15 + $0xa8] sm:$0xff] %v807_v44  ;;  %v809_v46 = vadd.f32 %v808_v45, %v1634_v1 }
 0x231   : > { %v810_v47 = vpop.f32.mrf.mxu1 }
 0x232   : > { %855 = vst [vmem:[%s1639_s15 + $0xb0] sm:$0xff] %v809_v46  ;;  %v811_v49 = vadd.f32 %v810_v47, %v1636_v2 }
 0x233   : > { %v814_v50 = vpop.f32.mrf.mxu1 }
 0x234   : > { %856 = vst [vmem:[%s1639_s15 + $0xb8] sm:$0xff] %v811_v49  ;;  %v815_v51 = vadd.f32 %v814_v50, %v1634_v1 }
 0x235   : > { %v816_v52 = vpop.f32.mrf.mxu1 }
 0x236   : > { %857 = vst [vmem:[%s1639_s15 + $0xc0] sm:$0xff] %v815_v51  ;;  %v817_v54 = vadd.f32 %v816_v52, %v1636_v2 }
 0x237   : > { %v818_v55 = vpop.f32.mrf.mxu1 }
 0x238   : > { %858 = vst [vmem:[%s1639_s15 + $0xc8] sm:$0xff] %v817_v54  ;;  %v819_v56 = vadd.f32 %v818_v55, %v1634_v1 }
 0x239   : > { %v820_v57 = vpop.f32.mrf.mxu1 }
 0x23a   : > { %859 = vst [vmem:[%s1639_s15 + $0xd0] sm:$0xff] %v819_v56  ;;  %v821_v58 = vadd.f32 %v820_v57, %v1636_v2 }
 0x23b   : > { %v824_v59 = vpop.f32.mrf.mxu1 }
 0x23c   : > { %860 = vst [vmem:[%s1639_s15 + $0xd8] sm:$0xff] %v821_v58  ;;  %v825_v60 = vadd.f32 %v824_v59, %v1634_v1 }
 0x23d   : > { %v826_v61 = vpop.f32.mrf.mxu1 }
 0x23e   : > { %861 = vst [vmem:[%s1639_s15 + $0xe0] sm:$0xff] %v825_v60  ;;  %v827_v62 = vadd.f32 %v826_v61, %v1636_v2 }
 0x23f   : > { %v828_v63 = vpop.f32.mrf.mxu1 }
 0x240   : > { %862 = vst [vmem:[%s1639_s15 + $0xe8] sm:$0xff] %v827_v62  ;;  %v829_v0 = vadd.f32 %v828_v63, %v1634_v1 }
 0x241   : > { %v830_v48 = vpop.f32.mrf.mxu1 }
 0x242   : > { %863 = vst [vmem:[%s1639_s15 + $0xf0] sm:$0xff] %v829_v0  ;;  %v831_v3 = vadd.f32 %v830_v48, %v1636_v2 }
 0x244   : > { %864 = vst [vmem:[%s1639_s15 + $0xf8] sm:$0xff] %v831_v3 }
 0x245   : > { %1340 = shalt.err (!%p1337_p9)
}
 0x246   : > { %s1341_s24 = scalar_lea.hbm %s1706_s27, 4096  ;;  %s1345_s10 = scalar_lea.hbm %s1759_s5, 8192 }
 0x247   : > { %p1342_p13 = scmp.ne.s32.totalorder %s1706_s27, %s1341_s24  ;;  %p1346_p4 = scmp.lt.s32.totalorder %s1706_s27, %s1759_s5 }
 0x248   : > { %p1347_p8 = scmp.lt.s32.totalorder %s1345_s10, %s1341_s24 }
 0x249   : > { %p1343_p5 = pnand %p1342_p13, %p1777_p10 }
 0x24a   : > { %p1348_p7 = por %p1347_p8, %p1346_p4 }
 0x24b   : > { %p1344_p0 = pneg %p1343_p5 }
 0x24d   : > { %p1349_p11 = pnand %p1348_p7, %p1344_p0 }
 0x24f   : > { %1352 = shalt.err (!%p1349_p11)
}
 0x250   : > { %s1406_s16 = smov 256   ;;  %s1407_s30 = smov 16  }
 0x251   : > { %1119 = dma.vmem_to_hbm [thread:$0]  (%p1777_p10), %s1708_s9, 4096, %s1706_s27, %s866_s22, %s1406_s16, %s1406_s16, %s1407_s30  }
 0x252 PF: > { %s895_s11 = sand.u32 1, %s1383_s18   ;;  %p1778_p1 = scmp.ne.s32.totalorder %s1766_s25, 0 }
 0x253   : > { %p1779_p2 = scmp.ge.s32.totalorder %s1395_s21, 2  ;;  %s896_s23 = scalar_lea.sflag [#allocation4], %s895_s11 }
 0x255   : > { %p1133_p6 = pnand %p1779_p2, %p1778_p1 }
 0x257   : > { %p1134_p12 = pneg %p1133_p6 }
 0x259   : > { %1378 = dma.done.wait (%p1134_p12), %s896_s23, 4096  }
 0x25a   : > { %1380 = vsyncadd (%p1134_p12), %s896_s23, 4294963200  ;;  %p19_p3 = scmp.ge.s32.totalorder %s1513_s17, 4   ;;  %s1780_s18 = smov %s1387_s19 }
 0x25b   : > { %s1781_s19 = smov %s1391_s20  ;;  %s1782_s20 = smov %s1522_s28 }
 0x25c   : > { %s1783_s21 = smov %s1513_s17  ;;  %21 = sbr.rel (!%p19_p3) target bundleno = 6 (0x6), region = 93 }
 0x261   :  { %901 = vsyncpa [#allocation3], 1 }
 0x262   :  { %903 = vsyncpa [#allocation3 + $0x1], 1 }
 0x263   :  { %904 = vsyncpa [#allocation6], 1 }
 0x264   :  { %905 = vsyncpa [#allocation4], 1 }
 0x265   :  { %907 = vsyncpa [#allocation4 + $0x1], 1 }

</bundles_post_ra>
